<compile_context>
chip_gen: v7x
topology: tpu7x:2x2x1
jax: 0.10.0
libtpu: 0.0.40
codegen_flags: <defaults>
</compile_context>

<pallas_src>
import functools
import numpy as np
import jax
import jax.numpy as jnp
from jax.experimental import pallas as pl
from jax.experimental.pallas import tpu as pltpu


# --------------------------- small helpers ----------------------------------

def _round_up(v, m):
    return (v + m - 1) // m * m


def _pick_tile(dim, candidates=(512, 256, 128)):
    for c in candidates:
        if dim % c == 0:
            return c
    return dim


# ----------------------------- Pallas kernels -------------------------------

def _matmul_affine_kernel(x_ref, w_ref, b_ref, o_ref, acc_ref, *, relu):
    # (TM, TK) @ (TK, TN) bf16 on the MXU, f32 accumulation in VMEM scratch,
    # per-output-channel shift (+ReLU) applied on the last K step.
    k = pl.program_id(2)

    @pl.when(k == 0)
    def _init():
        acc_ref[...] = jnp.zeros_like(acc_ref)

    acc_ref[...] += jnp.dot(x_ref[...], w_ref[...],
                            preferred_element_type=jnp.float32)

    @pl.when(k == pl.num_programs(2) - 1)
    def _finish():
        r = acc_ref[...] + b_ref[...]
        if relu:
            r = jnp.maximum(r, 0.0)
        o_ref[...] = r.astype(o_ref.dtype)


def _conv3x3_s1_kernel(x_ref, w_ref, b_ref, o_ref, *, Ho, Wp, relu):
    # x_ref: (1, Hp*Wp, Cin)  flattened zero-padded image (bf16)
    # w_ref: (9, Cin, Cout)   BN-scale-folded tap weights (bf16)
    # b_ref: (1, Cout)        BN shift (f32)
    # o_ref: (1, Ho*Wp, Cout) rows are Wp wide; columns >= Wo are junk
    m_run = Ho * Wp
    cout = w_ref.shape[2]
    acc = jnp.zeros((m_run, cout), jnp.float32)
    for ky in range(3):
        for kx in range(3):
            start = ky * Wp + kx                      # static offset
            win = x_ref[0, start:start + m_run, :]    # (m_run, Cin)
            acc = acc + jnp.dot(win, w_ref[3 * ky + kx],
                                preferred_element_type=jnp.float32)
    acc = acc + b_ref[...]
    if relu:
        acc = jnp.maximum(acc, 0.0)
    o_ref[0, :, :] = acc.astype(o_ref.dtype)


def _add_relu_kernel(x_ref, y_ref, o_ref):
    o_ref[...] = jnp.maximum(x_ref[...] + y_ref[...], 0.0).astype(o_ref.dtype)


def _max9_kernel(*refs):
    # 9 input tap tiles -> elementwise max.
    o_ref = refs[-1]
    m = refs[0][...]
    for r in refs[1:-1]:
        m = jnp.maximum(m, r[...])
    o_ref[...] = m


def _global_avgpool_kernel(x_ref, o_ref):
    # x_ref: (1, H*W, C) -> mean over spatial axis (f32).
    o_ref[...] = jnp.mean(x_ref[...].astype(jnp.float32), axis=1,
                          keepdims=True)


# ----------------------------- Pallas wrappers -------------------------------

def matmul_affine(x, w, shift, relu, out_dtype=jnp.bfloat16):
    """out = relu_opt(x @ w + shift); x:(M,K), w:(K,N) bf16, shift:(N,) f32."""
    M, K = x.shape
    Kw, N = w.shape
    assert K == Kw
    x = x.astype(jnp.bfloat16)
    w = w.astype(jnp.bfloat16)
    shift = shift.astype(jnp.float32)

    # Lane-dense output: pad N to a multiple of 128 (covers FC num_classes
    # and width-64 conv outputs).
    Np = _round_up(N, 128)
    if Np != N:
        w = jnp.pad(w, ((0, 0), (0, Np - N)))
        shift = jnp.pad(shift, ((0, Np - N),))
    Mp = _round_up(M, 8)
    if Mp != M:
        x = jnp.pad(x, ((0, Mp - M), (0, 0)))

    TM = _pick_tile(Mp)
    TN = 256 if Np % 256 == 0 else 128
    TK = _pick_tile(K)

    b2 = shift.reshape(1, Np)
    out = pl.pallas_call(
        functools.partial(_matmul_affine_kernel, relu=relu),
        out_shape=jax.ShapeDtypeStruct((Mp, Np), out_dtype),
        grid=(Mp // TM, Np // TN, K // TK),
        in_specs=[
            pl.BlockSpec((TM, TK), lambda i, j, k: (i, k)),
            pl.BlockSpec((TK, TN), lambda i, j, k: (k, j)),
            pl.BlockSpec((1, TN), lambda i, j, k: (0, j)),
        ],
        out_specs=pl.BlockSpec((TM, TN), lambda i, j, k: (i, j)),
        scratch_shapes=[pltpu.VMEM((TM, TN), jnp.float32)],
        compiler_params=pltpu.CompilerParams(
            dimension_semantics=("parallel", "parallel", "arbitrary")),
        cost_estimate=pl.CostEstimate(
            flops=2 * Mp * K * Np,
            transcendentals=0,
            bytes_accessed=2 * (Mp * K + K * Np)
            + Mp * Np * jnp.dtype(out_dtype).itemsize),
    )(x, w, b2)
    if Mp != M or Np != N:
        out = out[:M, :N]
    return out


def conv3x3_s1_bn_act(x, w, shift, relu):
    """3x3 stride-1 pad-1 conv + folded BN (+ReLU), no im2col in HBM.

    The padded image stays resident in VMEM for one grid step; the 9 tap
    GEMMs read shifted contiguous runs of the flattened image and accumulate
    in-kernel.  Output rows are Wp(=W+2) wide; junk columns are sliced off
    outside the kernel.
    """
    N, H, W, Cin = x.shape
    Cout = w.shape[-1]
    Ho, Wo = H, W
    Wp = W + 2
    # H padded by (1, 2): the extra bottom row keeps the last tap's
    # contiguous flat run in bounds (it only ever feeds junk columns).
    xp = jnp.pad(x.astype(jnp.bfloat16), ((0, 0), (1, 2), (1, 1), (0, 0)))
    xf = xp.reshape(N, (H + 3) * Wp, Cin)
    wt = w.reshape(9, Cin, Cout).astype(jnp.bfloat16)
    b2 = shift.reshape(1, Cout).astype(jnp.float32)
    m_run = Ho * Wp
    out = pl.pallas_call(
        functools.partial(_conv3x3_s1_kernel, Ho=Ho, Wp=Wp, relu=relu),
        out_shape=jax.ShapeDtypeStruct((N, m_run, Cout), jnp.bfloat16),
        grid=(N,),
        in_specs=[
            pl.BlockSpec((1, (H + 3) * Wp, Cin), lambda n: (n, 0, 0)),
            pl.BlockSpec((9, Cin, Cout), lambda n: (0, 0, 0)),
            pl.BlockSpec((1, Cout), lambda n: (0, 0)),
        ],
        out_specs=pl.BlockSpec((1, m_run, Cout), lambda n: (n, 0, 0)),
        compiler_params=pltpu.CompilerParams(
            dimension_semantics=("parallel",)),
        cost_estimate=pl.CostEstimate(
            flops=2 * N * Ho * Wo * 9 * Cin * Cout,
            transcendentals=0,
            bytes_accessed=2 * (int(np.prod(xf.shape))
                                + 9 * Cin * Cout + N * m_run * Cout)),
    )(xf, wt, b2)
    out = out.reshape(N, Ho, Wp, Cout)[:, :, :Wo, :]
    return out


def add_relu(x, y):
    shape = x.shape
    C = shape[-1]
    M = int(np.prod(shape[:-1]))
    xf = x.reshape(M, C)
    yf = y.reshape(M, C)
    Mp = _round_up(M, 8)
    if Mp != M:
        xf = jnp.pad(xf, ((0, Mp - M), (0, 0)))
        yf = jnp.pad(yf, ((0, Mp - M), (0, 0)))
    TM = _pick_tile(Mp, (1024, 512, 256, 128))
    out = pl.pallas_call(
        _add_relu_kernel,
        out_shape=jax.ShapeDtypeStruct((Mp, C), x.dtype),
        grid=(Mp // TM,),
        in_specs=[pl.BlockSpec((TM, C), lambda i: (i, 0)),
                  pl.BlockSpec((TM, C), lambda i: (i, 0))],
        out_specs=pl.BlockSpec((TM, C), lambda i: (i, 0)),
        compiler_params=pltpu.CompilerParams(
            dimension_semantics=("parallel",)),
    )(xf, yf)
    if Mp != M:
        out = out[:M]
    return out.reshape(shape)


def maxpool_3x3_s2_p1(x):
    """MaxPool2d(kernel=3, stride=2, padding=1) on NHWC (no 9x HBM stack)."""
    N, H, W, C = x.shape
    Ho = (H + 2 - 3) // 2 + 1
    Wo = (W + 2 - 3) // 2 + 1
    xp = jnp.pad(x, ((0, 0), (1, 1), (1, 1), (0, 0)),
                 constant_values=-jnp.inf)
    taps = [xp[:, ky:ky + 2 * Ho:2, kx:kx + 2 * Wo:2, :].reshape(N * Ho * Wo, C)
            for ky in range(3) for kx in range(3)]
    M = N * Ho * Wo
    Mp = _round_up(M, 8)
    if Mp != M:
        taps = [jnp.pad(t, ((0, Mp - M), (0, 0))) for t in taps]
    TM = _pick_tile(Mp)
    out = pl.pallas_call(
        _max9_kernel,
        out_shape=jax.ShapeDtypeStruct((Mp, C), x.dtype),
        grid=(Mp // TM,),
        in_specs=[pl.BlockSpec((TM, C), lambda i: (i, 0)) for _ in range(9)],
        out_specs=pl.BlockSpec((TM, C), lambda i: (i, 0)),
        compiler_params=pltpu.CompilerParams(
            dimension_semantics=("parallel",)),
    )(*taps)
    if Mp != M:
        out = out[:M]
    return out.reshape(N, Ho, Wo, C)


def global_avgpool(x):
    """AdaptiveAvgPool2d((1,1)) + flatten on NHWC -> (N, C) in f32."""
    N, H, W, C = x.shape
    xf = x.reshape(N, H * W, C)
    out = pl.pallas_call(
        _global_avgpool_kernel,
        out_shape=jax.ShapeDtypeStruct((N, 1, C), jnp.float32),
        grid=(N,),
        in_specs=[pl.BlockSpec((1, H * W, C), lambda n: (n, 0, 0))],
        out_specs=pl.BlockSpec((1, 1, C), lambda n: (n, 0, 0)),
        compiler_params=pltpu.CompilerParams(
            dimension_semantics=("parallel",)),
    )(xf)
    return out.reshape(N, C)


def conv_bn_act(x, w, shift, stride, padding, relu):
    """Conv2d (bias=False) + folded eval-BN + optional ReLU."""
    N, H, W, Cin = x.shape
    KH, KW, Cin_w, Cout = w.shape
    assert Cin == Cin_w
    if KH == 1 and KW == 1 and padding == 0:
        xs = x[:, ::stride, ::stride, :] if stride > 1 else x
        Ho, Wo = xs.shape[1], xs.shape[2]
        out = matmul_affine(xs.reshape(N * Ho * Wo, Cin),
                            w.reshape(Cin, Cout), shift, relu)
        return out.reshape(N, Ho, Wo, Cout)
    if KH == 3 and KW == 3 and stride == 1 and padding == 1:
        return conv3x3_s1_bn_act(x, w, shift, relu)
    # General im2col fallback (7x7/2 stem, three 3x3/2 downsampling convs).
    Ho = (H + 2 * padding - KH) // stride + 1
    Wo = (W + 2 * padding - KW) // stride + 1
    xp = jnp.pad(x, ((0, 0), (padding, padding), (padding, padding), (0, 0)))
    cols = [xp[:, ky:ky + stride * Ho:stride, kx:kx + stride * Wo:stride, :]
            for ky in range(KH) for kx in range(KW)]
    patches = jnp.concatenate(cols, axis=-1).reshape(N * Ho * Wo, KH * KW * Cin)
    out = matmul_affine(patches, w.reshape(KH * KW * Cin, Cout), shift, relu)
    return out.reshape(N, Ho, Wo, Cout)


# ----------------------------- parameter setup -------------------------------

class _KeyGen:
    def __init__(self, key):
        self._key = key
        self._i = 0

    def __call__(self):
        k = jax.random.fold_in(self._key, self._i)
        self._i += 1
        return k


def _he_conv(key, kh, kw, cin, cout):
    std = (2.0 / (kh * kw * cin)) ** 0.5
    return std * jax.random.normal(key, (kh, kw, cin, cout), jnp.float32)


def _bn_fold(key, c):
    """Eval-mode BatchNorm folded to y = x*scale + shift (synthetic stats)."""
    k1, k2, k3, k4 = jax.random.split(key, 4)
    gamma = 1.0 + 0.1 * jax.random.normal(k1, (c,), jnp.float32)
    beta = 0.1 * jax.random.normal(k2, (c,), jnp.float32)
    mean = 0.1 * jax.random.normal(k3, (c,), jnp.float32)
    var = 1.0 + 0.1 * jax.random.uniform(k4, (c,), jnp.float32)
    eps = 1e-5
    scale = gamma / jnp.sqrt(var + eps)
    shift = beta - mean * scale
    return scale, shift


def _conv_bn(kg, kh, kw, cin, cout):
    """He-init conv weight with BN scale folded in (bf16) + f32 shift."""
    w = _he_conv(kg(), kh, kw, cin, cout)
    scale, shift = _bn_fold(kg(), cout)
    w = (w * scale[None, None, None, :]).astype(jnp.bfloat16)
    return w, shift.astype(jnp.float32)


def make_resnet50_params(key, num_classes, input_channels=3):
    kg = _KeyGen(key)
    p = {}
    p['conv1_w'], p['conv1_b'] = _conv_bn(kg, 7, 7, input_channels, 64)
    # torchvision ResNet50: (blocks, bottleneck width, out channels, stride)
    layer_cfg = [(3, 64, 256, 1), (4, 128, 512, 2),
                 (6, 256, 1024, 2), (3, 512, 2048, 2)]
    in_c = 64
    layers = []
    for (nblocks, width, out_c, stride) in layer_cfg:
        blocks = []
        for bi in range(nblocks):
            s = stride if bi == 0 else 1
            blk = {'stride': s}
            blk['w1'], blk['b1'] = _conv_bn(kg, 1, 1, in_c, width)
            blk['w2'], blk['b2'] = _conv_bn(kg, 3, 3, width, width)
            blk['w3'], blk['b3'] = _conv_bn(kg, 1, 1, width, out_c)
            if bi == 0:
                blk['wd'], blk['bd'] = _conv_bn(kg, 1, 1, in_c, out_c)
            blocks.append(blk)
            in_c = out_c
        layers.append(blocks)
    p['layers'] = layers
    bound = 1.0 / np.sqrt(2048.0)
    p['fc_w'] = jax.random.uniform(kg(), (2048, num_classes), jnp.float32,
                                   -bound, bound).astype(jnp.bfloat16)
    p['fc_b'] = jax.random.uniform(kg(), (num_classes,), jnp.float32,
                                   -bound, bound)
    return p


# ------------------------------ forward pass ---------------------------------

def bottleneck(x, blk):
    out = conv_bn_act(x, blk['w1'], blk['b1'], stride=1, padding=0, relu=True)
    out = conv_bn_act(out, blk['w2'], blk['b2'], stride=blk['stride'],
                      padding=1, relu=True)
    out = conv_bn_act(out, blk['w3'], blk['b3'], stride=1, padding=0,
                      relu=False)
    if 'wd' in blk:
        identity = conv_bn_act(x, blk['wd'], blk['bd'], stride=blk['stride'],
                               padding=0, relu=False)
    else:
        identity = x
    return add_relu(out, identity)


def resnet50_forward(params, x_nchw):
    # PyTorch-convention NCHW input -> NHWC bf16.
    x = jnp.transpose(x_nchw, (0, 2, 3, 1)).astype(jnp.bfloat16)
    x = conv_bn_act(x, params['conv1_w'], params['conv1_b'],
                    stride=2, padding=3, relu=True)
    x = maxpool_3x3_s2_p1(x)
    for blocks in params['layers']:
        for blk in blocks:
            x = bottleneck(x, blk)
    x = global_avgpool(x)                                    # (N, 2048) f32
    logits = matmul_affine(x, params['fc_w'], params['fc_b'],
                           relu=False, out_dtype=jnp.float32)
    return logits


# ---------------------------------- main --------------------------------------

if __name__ == "__main__":
    key = jax.random.PRNGKey(0)
    num_classes = 10
    params = make_resnet50_params(jax.random.fold_in(key, 1),
                                  num_classes, input_channels=3)
    # Small input consistent with the module's forward (NCHW, 3 channels);
    # 64x64 keeps every stage's spatial size >= 2 through layer4.
    x = jax.random.normal(jax.random.fold_in(key, 2), (2, 3, 64, 64),
                          jnp.float32)
    logits = resnet50_forward(params, x)
    jax.block_until_ready(logits)
    assert logits.shape == (2, num_classes)
    assert bool(jnp.all(jnp.isfinite(logits)))
    print("KERNEL_OK")
</pallas_src>

<mosaic_0001>
module attributes {stable_mosaic.version = 11 : i64} {
  func.func @_matmul_affine_kernel(%arg0: i32, %arg1: i32, %arg2: i32, %arg3: memref<512x147xbf16, #tpu.memory_space<vmem>>, %arg4: memref<147x128xbf16, #tpu.memory_space<vmem>>, %arg5: memref<1x128xf32, #tpu.memory_space<vmem>>, %arg6: memref<512x128xbf16, #tpu.memory_space<vmem>>, %arg7: memref<512x128xf32, #tpu.memory_space<vmem>>) attributes {dimension_semantics = [#tpu.dimension_semantics<parallel>, #tpu.dimension_semantics<parallel>, #tpu.dimension_semantics<arbitrary>], iteration_bounds = array<i64: 4, 1, 1>, scalar_prefetch = 0 : i64, scratch_operands = 1 : i64, tpu.core_type = #tpu.core_type<tc>, window_params = [{transform_indices = @transform_0, window_bounds = array<i64: 512, 147>}, {transform_indices = @transform_1, window_bounds = array<i64: 147, 128>}, {transform_indices = @transform_2, window_bounds = array<i64: 1, 128>}, {transform_indices = @transform_3, window_bounds = array<i64: 512, 128>}]} {
    %c0_i32 = arith.constant 0 : i32
    %0 = arith.cmpi eq, %arg2, %c0_i32 : i32
    %1 = arith.extui %0 : i1 to i32
    %c0_i32_0 = arith.constant 0 : i32
    %2 = arith.cmpi ne, %1, %c0_i32_0 : i32
    scf.if %2 {
      %cst_10 = arith.constant 0.000000e+00 : f32
      %12 = vector.broadcast %cst_10 : f32 to vector<512x128xf32>
      %c0_11 = arith.constant 0 : index
      %c0_12 = arith.constant 0 : index
      %13 = vector.load %arg7[%c0_11, %c0_12] : memref<512x128xf32, #tpu.memory_space<vmem>>, vector<512x128xf32>
      tpu.vector_store %arg7[%c0_11, %c0_12], %12 {strides = array<i32>} : memref<512x128xf32, #tpu.memory_space<vmem>>, vector<512x128xf32>,
    } else {
    }
    %c0 = arith.constant 0 : index
    %c0_1 = arith.constant 0 : index
    %3 = vector.load %arg7[%c0, %c0_1] : memref<512x128xf32, #tpu.memory_space<vmem>>, vector<512x128xf32>
    %c0_2 = arith.constant 0 : index
    %c0_3 = arith.constant 0 : index
    %4 = vector.load %arg3[%c0_2, %c0_3] : memref<512x147xbf16, #tpu.memory_space<vmem>>, vector<512x147xbf16>
    %c0_4 = arith.constant 0 : index
    %c0_5 = arith.constant 0 : index
    %5 = vector.load %arg4[%c0_4, %c0_5] : memref<147x128xbf16, #tpu.memory_space<vmem>>, vector<147x128xbf16>
    %cst = arith.constant dense<0.000000e+00> : vector<512x128xf32>
    %6 = tpu.matmul %4, %5, %cst {dimension_numbers = #tpu.dot_dimension_numbers<[1], [0], [0], [1], [0, 0, 1, 1], [], []>} : vector<512x147xbf16>, vector<147x128xbf16>, vector<512x128xf32> -> vector<512x128xf32>
    %7 = arith.addf %3, %6 : vector<512x128xf32>
    %c0_6 = arith.constant 0 : index
    %c0_7 = arith.constant 0 : index
    %8 = vector.load %arg7[%c0_6, %c0_7] : memref<512x128xf32, #tpu.memory_space<vmem>>, vector<512x128xf32>
    tpu.vector_store %arg7[%c0_6, %c0_7], %7 {strides = array<i32>} : memref<512x128xf32, #tpu.memory_space<vmem>>, vector<512x128xf32>,
    %c0_i32_8 = arith.constant 0 : i32
    %9 = arith.cmpi eq, %arg2, %c0_i32_8 : i32
    %10 = arith.extui %9 : i1 to i32
    %c0_i32_9 = arith.constant 0 : i32
    %11 = arith.cmpi ne, %10, %c0_i32_9 : i32
    scf.if %11 {
      %c0_10 = arith.constant 0 : index
      %c0_11 = arith.constant 0 : index
      %12 = vector.load %arg7[%c0_10, %c0_11] : memref<512x128xf32, #tpu.memory_space<vmem>>, vector<512x128xf32>
      %c0_12 = arith.constant 0 : index
      %c0_13 = arith.constant 0 : index
      %13 = vector.load %arg5[%c0_12, %c0_13] : memref<1x128xf32, #tpu.memory_space<vmem>>, vector<1x128xf32>
      %14 = vector.broadcast %13 : vector<1x128xf32> to vector<512x128xf32>
      %15 = arith.addf %12, %14 : vector<512x128xf32>
      %cst_14 = arith.constant 0.000000e+00 : f32
      %16 = vector.broadcast %cst_14 : f32 to vector<512x128xf32>
      %17 = arith.maximumf %15, %16 : vector<512x128xf32>
      %18 = arith.truncf %17 : vector<512x128xf32> to vector<512x128xbf16>
      %c0_15 = arith.constant 0 : index
      %c0_16 = arith.constant 0 : index
      %19 = vector.load %arg6[%c0_15, %c0_16] : memref<512x128xbf16, #tpu.memory_space<vmem>>, vector<512x128xbf16>
      tpu.vector_store %arg6[%c0_15, %c0_16], %18 {strides = array<i32>} : memref<512x128xbf16, #tpu.memory_space<vmem>>, vector<512x128xbf16>,
    } else {
    }
    return
  }
  func.func @transform_0(%arg0: i32, %arg1: i32, %arg2: i32) -> (i32, i32) {
    %c0_i32 = arith.constant 0 : i32
    return %arg0, %arg2 : i32, i32
  }
  func.func @transform_1(%arg0: i32, %arg1: i32, %arg2: i32) -> (i32, i32) {
    %c0_i32 = arith.constant 0 : i32
    return %arg2, %arg1 : i32, i32
  }
  func.func @transform_2(%arg0: i32, %arg1: i32, %arg2: i32) -> (i32, i32) {
    %c0_i32 = arith.constant 0 : i32
    %c0_i32_0 = arith.constant 0 : i32
    return %c0_i32, %arg1 : i32, i32
  }
  func.func @transform_3(%arg0: i32, %arg1: i32, %arg2: i32) -> (i32, i32) {
    %c0_i32 = arith.constant 0 : i32
    return %arg0, %arg1 : i32, i32
  }
}

</mosaic_0001>

<bundles_post_ra>
// kernel: tpu_custom_call.1
= control target key start
LH: loop header
LB: loop body
LE: loop exit
PB: predicated region body
PF: predicated region fallthrough
CT: control target
= control target key end

     0   :  { %8 = vsyncpa [#allocation4], 0  ;;  %s3073_s0 = inlined_call_operand.vmem [shape: bf16[2048,147], index: 0, kind: input, shape index: {}]   ;;  %s3074_s1 = inlined_call_operand.vmem [shape: bf16[147,128], index: 1, kind: input, shape index: {}]   ;;  %s3075_s2 = inlined_call_operand.vmem [shape: f32[1,128], index: 2, kind: input, shape index: {}]   ;;  %s3076_s3 = inlined_call_operand.hbm [shape: bf16[2048,128], index: 3, kind: output, shape index: {}]  }
   0x1   :  { %10 = vsyncpa [#allocation4 + $0x1], 0  ;;  %s2723_s12 = smov 0   ;;  %s2725_s13 = smov 0  }
   0x2   :  { %s2727_s14 = smov 0   ;;  %s2729_s15 = smov 0  }
   0x3   :  { %s2731_s16 = smov 0   ;;  %s2733_s17 = smov 0  }
   0x4 LB: > { %s1989_s18 = sadd.s32 4294967295, %s2696_s17   ;;  %s1990_s19 = sadd.s32 4294967294, %s2696_s17   ;;  %s2696_s17 = sphi %s2733_s17, %s16_s17   ;;  %s2692_s16 = sphi %s2731_s16, %s3083_s16   ;;  %s2688_s15 = sphi %s2729_s15, %s3082_s15   ;;  %s2684_s14 = sphi %s2727_s14, %s3081_s14   ;;  %s2680_s13 = sphi %s2725_s13, %s3080_s13   ;;  %s2676_s12 = sphi %s2723_s12, %s3079_s12  }
   0x5   : > { %s35_s20 = sadd.s32 1, %s2692_s16  ;;  %s126_s21 = sadd.s32 1, %s2684_s14 }
   0x6   : > { %p37_p0 = scmp.ge.s32.totalorder %s35_s20, 4  ;;  %p136_p1 = scmp.ne.s32.totalorder %s2684_s14, %s2680_s13 }
   0x7   : > { %p137_p2 = scmp.eq.s32.totalorder %s1989_s18, 3  ;;  %p142_p3 = scmp.ne.s32.totalorder %s2680_s13, %s2676_s12 }
   0x8   : > { %s3085_s20 = smov (%p37_p0, %s35_s20), 0  ;;  %p143_p5 = scmp.eq.s32.totalorder %s1990_s19, 3 }
   0x9   : > { %p2763_p4 = por %p137_p2, %p136_p1  ;;  %s121_s23 = ssub.s32 %s2692_s16, %s3085_s20 }
   0xa   : > { %p1995_p6 = scmp.ge.s32.totalorder %s2696_s17, 1  ;;  %p124_p7 = scmp.eq.s32.totalorder %s121_s23, 0 }
   0xb   : > { %p2770_p8 = por %p143_p5, %p142_p3  ;;  %p194_p9 = scmp.lt.s32.totalorder %s2696_s17, 5 }
   0xc   : > { %s2776_s25 = scalar_select %p124_p7, %s2684_s14, %s126_s21  }
   0xd   : > { %p195_p10 = pnand %p1995_p6, %p194_p9 }
   0xe   : > { %v2512_v0 = vld [vmem:[%s3074_s1] sm:$0xff] (!%p195_p10)   ;;  %v2698_v1 = vmov (!%p195_p10), 0   ;;  %v2513_v2 = vld [vmem:[%s3074_s1 + $0x8] sm:$0xff] (!%p195_p10)   ;;  %v2514_v3 = vld [vmem:[%s3074_s1 + $0x10] sm:$0xff] (!%p195_p10)   ;;  %s1997_s5 = sshll.u32 (!%p195_p10), %s2688_s15, 6  ;;  %vm820_vm0 = vcmask (!%p195_p10), 154624  }
   0xf   : > { %198 = sbr.rel (%p195_p10) target bundleno = 410 (0x19a), region = 32  ;;  %924 = vmatprep.subr.bf16.mxu0 (!%p195_p10), %v2698_v1  ;;  %2433 = vmatprep.subr.bf16.mxu1 (!%p195_p10), %v2698_v1  ;;  %p236_p11 = scmp.lt.s32.totalorder (!%p195_p10), %s1997_s5, 255  ;;  %v2515_v4 = vld [vmem:[%s3074_s1 + $0x18] sm:$0xff] (!%p195_p10)   ;;  %v2516_v5 = vld [vmem:[%s3074_s1 + $0x20] sm:$0xff] (!%p195_p10)   ;;  %v2517_v8 = vld [vmem:[%s3074_s1 + $0x28] sm:$0xff] (!%p195_p10)   ;;  %vm917_vm1 = vcmask (!%p195_p10), 1040384  }
  0x10   : > { %925 = vmatpush1.bf16.msra.mxu0 (!%p195_p10), %v2512_v0  ;;  %2443 = vmatpush1.bf16.msra.mxu1 (!%p195_p10), %v2512_v0  ;;  %v2518_v9 = vld [vmem:[%s3074_s1 + $0x30] sm:$0xff] (!%p195_p10)   ;;  %v2519_v10 = vld [vmem:[%s3074_s1 + $0x38] sm:$0xff] (!%p195_p10)   ;;  %vm918_vm2 = vcmask (!%p195_p10), 1041408   ;;  %v2699_v11 = vmov (!%p195_p10), 65535   ;;  %v2520_v13 = vld [vmem:[%s3074_s1 + $0x40] sm:$0xff] (!%p195_p10)   ;;  %s231_s9 = sand.u32 (!%p195_p10), 1, %s2680_s13  }
  0x11   : > { %926 = vmatprep.subr.bf16.mxu0 (!%p195_p10), %v2698_v1  ;;  %2434 = vmatprep.subr.bf16.mxu1 (!%p195_p10), %v2698_v1  ;;  %v919_v12 = vsel (!%p195_p10), %vm917_vm1, 4294967295, %v2699_v11  ;;  %v2521_v14 = vld [vmem:[%s3074_s1 + $0x48] ss:$0 sps:$4 sm:$0x33] (!%p195_p10)   ;;  %s1996_s10 = sshll.u32 (!%p195_p10), %s231_s9, 8  ;;  %s2241_s18 = sshll.u32 (!%p195_p10), %s2688_s15, 12 }
  0x12   : > { %v920_v15 = vsel (!%p195_p10), %vm918_vm2, %v919_v12, 0  ;;  %s3019_s26 = scalar_lea.hbm (!%p195_p10), %s3076_s3, %s2241_s18  ;;  %s3027_s15 = scalar_lea.sflag (!%p195_p10), [#allocation4], %s231_s9 }
  0x13   : > { %v922_v16 = vand.u32 (!%p195_p10), %v2521_v14, %v920_v15  ;;  %v2913_v15 = vld [vmem:[%s3075_s2] ss:$0 sm:$0xff] (!%p195_p10)  ;;  %s2700_s28 = smov (!%p195_p10), [#allocation3]  }
  0x14   : > { %927 = vmatpush1.bf16.msra.mxu0 (!%p195_p10), %v2513_v2  ;;  %2444 = vmatpush1.bf16.msra.mxu1 (!%p195_p10), %v2513_v2  ;;  %s2622_s29 = sshll.u32 (!%p195_p10), %s2700_s28, 4  ;;  %s2623_s29 = int_to_ptr.vmem [resolvable:$false] %s2622_s29 }
  0x15   : > { %928 = vmatprep.subr.bf16.mxu0 (!%p195_p10), %v2698_v1  ;;  %2435 = vmatprep.subr.bf16.mxu1 (!%p195_p10), %v2698_v1  ;;  %s2624_s30 = scalar_lea.vmem (!%p195_p10), %s2623_s29, 8192 }
  0x16   : > { %s3087_s5 = smov (!%p236_p11, %s1997_s5), 255 }
  0x17   : > { %s2176_s8 = sshll.u32 %s3087_s5, 3 }
  0x18   : > { %929 = vmatpush1.bf16.msra.mxu0 %v2514_v3  ;;  %2445 = vmatpush1.bf16.msra.mxu1 %v2514_v3  ;;  %s2794_s11 = scalar_lea.vmem %s3073_s0, %s2176_s8 }
  0x19   : > { %930 = vmatprep.subr.bf16.mxu0 %v2698_v1  ;;  %2436 = vmatprep.subr.bf16.mxu1 %v2698_v1  ;;  %v2524_v6 = vld [vmem:[%s2794_s11 + $0x4] ss:$8 sps:$4 sm:$0xff]   ;;  %v2522_v17 = vld [vmem:[%s2794_s11] ss:$8 sps:$4 sm:$0xff]   ;;  %v2528_v19 = vld [vmem:[%s2794_s11 + $0x14] ss:$8 sps:$4 sm:$0xff]  }
  0x1a   : > { %v2527_v7 = vld [vmem:[%s2794_s11 + $0x104] ss:$8 sps:$4 sm:$0xff]   ;;  %2074 = vmatprep.mubr.msk.bf16.mxu0 %vm820_vm0, %v2524_v6  ;;  %v2525_v18 = vld [vmem:[%s2794_s11 + $0x100] ss:$8 sps:$4 sm:$0xff]   ;;  %v2530_v20 = vld [vmem:[%s2794_s11 + $0x114] ss:$8 sps:$4 sm:$0xff]  }
  0x1b   : > { %2090 = vmatprep.mubr.msk.bf16.mxu1 %vm820_vm0, %v2527_v7  ;;  %v2532_v21 = vld [vmem:[%s2794_s11 + $0x10] ss:$8 sps:$4 sm:$0xff]   ;;  %v2534_v23 = vld [vmem:[%s2794_s11 + $0x24] ss:$8 sps:$4 sm:$0xff]   ;;  %v2538_v25 = vld [vmem:[%s2794_s11 + $0x20] ss:$8 sps:$4 sm:$0xff]  }
  0x1c   : > { %931 = vmatpush1.bf16.msra.mxu0 %v2515_v4  ;;  %2446 = vmatpush1.bf16.msra.mxu1 %v2515_v4  ;;  %v2533_v22 = vld [vmem:[%s2794_s11 + $0x110] ss:$8 sps:$4 sm:$0xff]   ;;  %v2536_v24 = vld [vmem:[%s2794_s11 + $0x124] ss:$8 sps:$4 sm:$0xff]   ;;  %v2539_v26 = vld [vmem:[%s2794_s11 + $0x120] ss:$8 sps:$4 sm:$0xff]  }
  0x1d   : > { %932 = vmatprep.subr.bf16.mxu0 %v2698_v1  ;;  %2437 = vmatprep.subr.bf16.mxu1 %v2698_v1  ;;  %v2540_v27 = vld [vmem:[%s2794_s11 + $0x34] ss:$8 sps:$4 sm:$0xff]   ;;  %v2544_v29 = vld [vmem:[%s2794_s11 + $0x30] ss:$8 sps:$4 sm:$0xff]   ;;  %v2546_v31 = vld [vmem:[%s2794_s11 + $0x44] ss:$8 sps:$4 sm:$0xff]  }
  0x1e   : > { %v2542_v28 = vld [vmem:[%s2794_s11 + $0x134] ss:$8 sps:$4 sm:$0xff]   ;;  %v2545_v30 = vld [vmem:[%s2794_s11 + $0x130] ss:$8 sps:$4 sm:$0xff]   ;;  %v2548_v32 = vld [vmem:[%s2794_s11 + $0x144] ss:$8 sps:$4 sm:$0xff]  }
  0x1f   : > { %v2550_v33 = vld [vmem:[%s2794_s11 + $0x40] ss:$8 sps:$4 sm:$0xff]   ;;  %v2552_v35 = vld [vmem:[%s2794_s11 + $0x54] ss:$8 sps:$4 sm:$0xff]   ;;  %v2556_v37 = vld [vmem:[%s2794_s11 + $0x50] ss:$8 sps:$4 sm:$0xff]  }
  0x20   : > { %933 = vmatpush1.bf16.msra.mxu0 %v2516_v5  ;;  %2447 = vmatpush1.bf16.msra.mxu1 %v2516_v5  ;;  %v2551_v34 = vld [vmem:[%s2794_s11 + $0x140] ss:$8 sps:$4 sm:$0xff]   ;;  %v2554_v36 = vld [vmem:[%s2794_s11 + $0x154] ss:$8 sps:$4 sm:$0xff]   ;;  %v2557_v38 = vld [vmem:[%s2794_s11 + $0x150] ss:$8 sps:$4 sm:$0xff]  }
  0x21   : > { %934 = vmatprep.subr.bf16.mxu0 %v2698_v1  ;;  %2438 = vmatprep.subr.bf16.mxu1 %v2698_v1  ;;  %v2558_v39 = vld [vmem:[%s2794_s11 + $0x64] ss:$8 sps:$4 sm:$0xff]   ;;  %v2562_v41 = vld [vmem:[%s2794_s11 + $0x60] ss:$8 sps:$4 sm:$0xff]   ;;  %v2564_v43 = vld [vmem:[%s2794_s11 + $0x74] ss:$8 sps:$4 sm:$0xff]  }
  0x22   : > { %v2560_v40 = vld [vmem:[%s2794_s11 + $0x164] ss:$8 sps:$4 sm:$0xff]   ;;  %v2563_v42 = vld [vmem:[%s2794_s11 + $0x160] ss:$8 sps:$4 sm:$0xff]   ;;  %v2566_v44 = vld [vmem:[%s2794_s11 + $0x174] ss:$8 sps:$4 sm:$0xff]  }
  0x23   : > { %v2568_v45 = vld [vmem:[%s2794_s11 + $0x70] ss:$8 sps:$4 sm:$0xff]   ;;  %v2570_v47 = vld [vmem:[%s2794_s11 + $0x84] ss:$8 sps:$4 sm:$0xff]   ;;  %v2574_v49 = vld [vmem:[%s2794_s11 + $0x80] ss:$8 sps:$4 sm:$0xff]  }
  0x24   : > { %935 = vmatpush1.bf16.msra.mxu0 %v2517_v8  ;;  %2448 = vmatpush1.bf16.msra.mxu1 %v2517_v8  ;;  %v2569_v46 = vld [vmem:[%s2794_s11 + $0x170] ss:$8 sps:$4 sm:$0xff]   ;;  %v2572_v48 = vld [vmem:[%s2794_s11 + $0x184] ss:$8 sps:$4 sm:$0xff]   ;;  %v2575_v50 = vld [vmem:[%s2794_s11 + $0x180] ss:$8 sps:$4 sm:$0xff]  }
  0x25   : > { %936 = vmatprep.subr.bf16.mxu0 %v2698_v1  ;;  %2439 = vmatprep.subr.bf16.mxu1 %v2698_v1  ;;  %v2576_v51 = vld [vmem:[%s2794_s11 + $0x94] ss:$8 sps:$4 sm:$0xff]   ;;  %v2580_v53 = vld [vmem:[%s2794_s11 + $0x90] ss:$8 sps:$4 sm:$0xff]   ;;  %v2582_v55 = vld [vmem:[%s2794_s11 + $0xa4] ss:$8 sps:$4 sm:$0xff]  }
  0x26   : > { %v2578_v52 = vld [vmem:[%s2794_s11 + $0x194] ss:$8 sps:$4 sm:$0xff]   ;;  %v2581_v54 = vld [vmem:[%s2794_s11 + $0x190] ss:$8 sps:$4 sm:$0xff]   ;;  %v2584_v56 = vld [vmem:[%s2794_s11 + $0x1a4] ss:$8 sps:$4 sm:$0xff]  }
  0x27   : > { %v2586_v57 = vld [vmem:[%s2794_s11 + $0xa0] ss:$8 sps:$4 sm:$0xff]   ;;  %v2588_v59 = vld [vmem:[%s2794_s11 + $0xb4] ss:$8 sps:$4 sm:$0xff]   ;;  %v2592_v61 = vld [vmem:[%s2794_s11 + $0xb0] ss:$8 sps:$4 sm:$0xff]  }
  0x28   : > { %937 = vmatpush1.bf16.msra.mxu0 %v2518_v9  ;;  %2449 = vmatpush1.bf16.msra.mxu1 %v2518_v9  ;;  %v2587_v58 = vld [vmem:[%s2794_s11 + $0x1a0] ss:$8 sps:$4 sm:$0xff]   ;;  %v2590_v60 = vld [vmem:[%s2794_s11 + $0x1b4] ss:$8 sps:$4 sm:$0xff]   ;;  %v2593_v62 = vld [vmem:[%s2794_s11 + $0x1b0] ss:$8 sps:$4 sm:$0xff]  }
  0x29   : > { %938 = vmatprep.subr.bf16.mxu0 %v2698_v1  ;;  %2440 = vmatprep.subr.bf16.mxu1 %v2698_v1  ;;  %v2594_v63 = vld [vmem:[%s2794_s11 + $0xc4] ss:$8 sps:$4 sm:$0xff]   ;;  %v2599_v2 = vld [vmem:[%s2794_s11 + $0x1c0] ss:$8 sps:$4 sm:$0xff]   ;;  %v2600_v3 = vld [vmem:[%s2794_s11 + $0xd4] ss:$8 sps:$4 sm:$0xff]  }
  0x2a   : > { %v2596_v0 = vld [vmem:[%s2794_s11 + $0x1c4] ss:$8 sps:$4 sm:$0xff]   ;;  %v2602_v4 = vld [vmem:[%s2794_s11 + $0x1d4] ss:$8 sps:$4 sm:$0xff]   ;;  %v2604_v5 = vld [vmem:[%s2794_s11 + $0xd0] ss:$8 sps:$4 sm:$0xff]  }
  0x2b   : > { %v2605_v6 = vld [vmem:[%s2794_s11 + $0x1d0] ss:$8 sps:$4 sm:$0xff]   ;;  %v2606_v7 = vld [vmem:[%s2794_s11 + $0xe4] ss:$8 sps:$4 sm:$0xff]   ;;  %v2610_v9 = vld [vmem:[%s2794_s11 + $0xe0] ss:$8 sps:$4 sm:$0xff]  }
  0x2c   : > { %939 = vmatpush1.bf16.msra.mxu0 %v2519_v10  ;;  %2450 = vmatpush1.bf16.msra.mxu1 %v2519_v10  ;;  %v2608_v8 = vld [vmem:[%s2794_s11 + $0x1e4] ss:$8 sps:$4 sm:$0xff]   ;;  %v2611_v10 = vld [vmem:[%s2794_s11 + $0x1e0] ss:$8 sps:$4 sm:$0xff]   ;;  %v2612_v11 = vld [vmem:[%s2794_s11 + $0xf4] ss:$8 sps:$4 sm:$0xff]  }
  0x2d   : > { %940 = vmatprep.subr.bf16.mxu0 %v2698_v1  ;;  %2441 = vmatprep.subr.bf16.mxu1 %v2698_v1  ;;  %v2614_v12 = vld [vmem:[%s2794_s11 + $0x1f4] ss:$8 sps:$4 sm:$0xff]   ;;  %v2617_v14 = vld [vmem:[%s2794_s11 + $0x1f0] ss:$8 sps:$4 sm:$0xff]  }
  0x30   : > { %941 = vmatpush1.bf16.msra.mxu0 %v2520_v13  ;;  %2451 = vmatpush1.bf16.msra.mxu1 %v2520_v13  ;;  %v2616_v13 = vld [vmem:[%s2794_s11 + $0xf0] ss:$8 sps:$4 sm:$0xff]  }
  0x31   : > { %942 = vmatprep.subr.bf16.mxu0 %v2698_v1  ;;  %2442 = vmatprep.subr.bf16.mxu1 %v2698_v1  ;;  %v2598_v1 = vld [vmem:[%s2794_s11 + $0xc0] ss:$8 sps:$4 sm:$0xff]   ;;  %s2922_s11 = scalar_lea.vmem [#allocation3], %s1996_s10 }
  0x32   : > { %s1878_s19 = sshll.u32 %s2922_s11, 4  ;;  %s3021_s19 = int_to_ptr.vmem [resolvable:$true] %s1878_s19 }
  0x33   : > { %s2618_s27 = scalar_lea.vmem %s3021_s19, 4096  ;;  %p2625_p1 = scmp.lt.s32.totalorder %s3021_s19, %s2623_s29 }
  0x34   : > { %943 = vmatpush1.bf16.msra.mxu0 %v922_v16  ;;  %2452 = vmatpush1.bf16.msra.mxu1 %v922_v16  ;;  %p2619_p12 = scmp.ne.s32.totalorder %s3021_s19, %s2618_s27  ;;  %p2626_p2 = scmp.lt.s32.totalorder %s2624_s30, %s2618_s27 }
  0x36   : > { %p2620_p13 = pnand %p2619_p12, %p2763_p4  ;;  %p2627_p3 = por %p2626_p2, %p2625_p1 }
  0x37   : > { %957 = vmatmul.mubr.bf16.vlgmr.msra.gmra.mrb[0].mxu0 %v2522_v17  ;;  %1085 = vmatmul.mubr.bf16.vlgmr.msra.gmra.mrb[0].mxu1 %v2525_v18 }
  0x38   : > { %2075 = vmatprep.mubr.msk.bf16.mxu0 %vm820_vm0, %v2528_v19  ;;  %2091 = vmatprep.mubr.msk.bf16.mxu1 %vm820_vm0, %v2530_v20  ;;  %p2621_p0 = pneg %p2620_p13 }
  0x3a   : > { %p2628_p5 = pnand %p2627_p3, %p2621_p0 }
  0x3f   : > { %965 = vmatmul.mubr.bf16.gmra.mrb[4].mxu0 %v2532_v21  ;;  %1093 = vmatmul.mubr.bf16.gmra.mrb[4].mxu1 %v2533_v22 }
  0x40   : > { %2076 = vmatprep.mubr.msk.bf16.mxu0 %vm820_vm0, %v2534_v23  ;;  %2092 = vmatprep.mubr.msk.bf16.mxu1 %vm820_vm0, %v2536_v24 }
  0x47   : > { %973 = vmatmul.mubr.bf16.gmra.mrb[8].mxu0 %v2538_v25  ;;  %1101 = vmatmul.mubr.bf16.gmra.mrb[8].mxu1 %v2539_v26 }
  0x48   : > { %2077 = vmatprep.mubr.msk.bf16.mxu0 %vm820_vm0, %v2540_v27  ;;  %2093 = vmatprep.mubr.msk.bf16.mxu1 %vm820_vm0, %v2542_v28 }
  0x4f   : > { %981 = vmatmul.mubr.bf16.gmra.mrb[12].mxu0 %v2544_v29  ;;  %1109 = vmatmul.mubr.bf16.gmra.mrb[12].mxu1 %v2545_v30 }
  0x50   : > { %2078 = vmatprep.mubr.msk.bf16.mxu0 %vm820_vm0, %v2546_v31  ;;  %2094 = vmatprep.mubr.msk.bf16.mxu1 %vm820_vm0, %v2548_v32 }
  0x57   : > { %989 = vmatmul.mubr.bf16.gmra.mrb[16].mxu0 %v2550_v33  ;;  %1117 = vmatmul.mubr.bf16.gmra.mrb[16].mxu1 %v2551_v34 }
  0x58   : > { %2079 = vmatprep.mubr.msk.bf16.mxu0 %vm820_vm0, %v2552_v35  ;;  %2095 = vmatprep.mubr.msk.bf16.mxu1 %vm820_vm0, %v2554_v36 }
  0x5f   : > { %997 = vmatmul.mubr.bf16.gmra.mrb[20].mxu0 %v2556_v37  ;;  %1125 = vmatmul.mubr.bf16.gmra.mrb[20].mxu1 %v2557_v38 }
  0x60   : > { %2080 = vmatprep.mubr.msk.bf16.mxu0 %vm820_vm0, %v2558_v39  ;;  %2096 = vmatprep.mubr.msk.bf16.mxu1 %vm820_vm0, %v2560_v40 }
  0x67   : > { %1005 = vmatmul.mubr.bf16.gmra.mrb[24].mxu0 %v2562_v41  ;;  %1133 = vmatmul.mubr.bf16.gmra.mrb[24].mxu1 %v2563_v42 }
  0x68   : > { %2081 = vmatprep.mubr.msk.bf16.mxu0 %vm820_vm0, %v2564_v43  ;;  %2097 = vmatprep.mubr.msk.bf16.mxu1 %vm820_vm0, %v2566_v44 }
  0x6f   : > { %1013 = vmatmul.mubr.bf16.gmra.mrb[28].mxu0 %v2568_v45  ;;  %1141 = vmatmul.mubr.bf16.gmra.mrb[28].mxu1 %v2569_v46 }
  0x70   : > { %2082 = vmatprep.mubr.msk.bf16.mxu0 %vm820_vm0, %v2570_v47  ;;  %2098 = vmatprep.mubr.msk.bf16.mxu1 %vm820_vm0, %v2572_v48 }
  0x77   : > { %1021 = vmatmul.mubr.bf16.gmra.mrb[32].mxu0 %v2574_v49  ;;  %1149 = vmatmul.mubr.bf16.gmra.mrb[32].mxu1 %v2575_v50 }
  0x78   : > { %2083 = vmatprep.mubr.msk.bf16.mxu0 %vm820_vm0, %v2576_v51  ;;  %2099 = vmatprep.mubr.msk.bf16.mxu1 %vm820_vm0, %v2578_v52 }
  0x7f   : > { %1029 = vmatmul.mubr.bf16.gmra.mrb[36].mxu0 %v2580_v53  ;;  %1157 = vmatmul.mubr.bf16.gmra.mrb[36].mxu1 %v2581_v54 }
  0x80   : > { %2084 = vmatprep.mubr.msk.bf16.mxu0 %vm820_vm0, %v2582_v55  ;;  %2100 = vmatprep.mubr.msk.bf16.mxu1 %vm820_vm0, %v2584_v56 }
  0x87   : > { %1037 = vmatmul.mubr.bf16.gmra.mrb[40].mxu0 %v2586_v57  ;;  %1165 = vmatmul.mubr.bf16.gmra.mrb[40].mxu1 %v2587_v58 }
  0x88   : > { %2085 = vmatprep.mubr.msk.bf16.mxu0 %vm820_vm0, %v2588_v59  ;;  %2101 = vmatprep.mubr.msk.bf16.mxu1 %vm820_vm0, %v2590_v60 }
  0x8f   : > { %1045 = vmatmul.mubr.bf16.gmra.mrb[44].mxu0 %v2592_v61  ;;  %1173 = vmatmul.mubr.bf16.gmra.mrb[44].mxu1 %v2593_v62 }
  0x90   : > { %2086 = vmatprep.mubr.msk.bf16.mxu0 %vm820_vm0, %v2594_v63  ;;  %2102 = vmatprep.mubr.msk.bf16.mxu1 %vm820_vm0, %v2596_v0 }
  0x97   : > { %1053 = vmatmul.mubr.bf16.gmra.mrb[48].mxu0 %v2598_v1  ;;  %1181 = vmatmul.mubr.bf16.gmra.mrb[48].mxu1 %v2599_v2 }
  0x98   : > { %2087 = vmatprep.mubr.msk.bf16.mxu0 %vm820_vm0, %v2600_v3  ;;  %2103 = vmatprep.mubr.msk.bf16.mxu1 %vm820_vm0, %v2602_v4 }
  0x9f   : > { %1061 = vmatmul.mubr.bf16.gmra.mrb[52].mxu0 %v2604_v5  ;;  %1189 = vmatmul.mubr.bf16.gmra.mrb[52].mxu1 %v2605_v6 }
  0xa0   : > { %2088 = vmatprep.mubr.msk.bf16.mxu0 %vm820_vm0, %v2606_v7  ;;  %2104 = vmatprep.mubr.msk.bf16.mxu1 %vm820_vm0, %v2608_v8 }
  0xa7   : > { %1069 = vmatmul.mubr.bf16.gmra.mrb[56].mxu0 %v2610_v9  ;;  %1197 = vmatmul.mubr.bf16.gmra.mrb[56].mxu1 %v2611_v10 }
  0xa8   : > { %2089 = vmatprep.mubr.msk.bf16.mxu0 %vm820_vm0, %v2612_v11  ;;  %2105 = vmatprep.mubr.msk.bf16.mxu1 %vm820_vm0, %v2614_v12 }
  0xaf   : > { %1077 = vmatmul.mubr.bf16.gmra.mrb[60].mxu0 %v2616_v13  ;;  %1205 = vmatmul.mubr.bf16.gmra.mrb[60].mxu1 %v2617_v14 }
 0x10a   : > { %v958_v16 = vpop.f32.mrb[0].mxu0  ;;  %v1086_v17 = vpop.f32.mrb[0].mxu1 }
 0x10b   : > { %v1415_v18 = vadd.f32 %v2913_v15, %v958_v16  ;;  %v1447_v19 = vadd.f32 %v2913_v15, %v1086_v17  ;;  %v960_v20 = vpop.f32.mrb[1].mxu0  ;;  %v1088_v21 = vpop.f32.mrb[1].mxu1 }
 0x10c   : > { %v961_v22 = vpop.f32.mrb[2].mxu0  ;;  %v1089_v23 = vpop.f32.mrb[2].mxu1 }
 0x10d   : > { %v1416_v24 = vadd.f32 %v2913_v15, %v961_v22  ;;  %v1448_v25 = vadd.f32 %v2913_v15, %v1089_v23  ;;  %v963_v26 = vpop.f32.mrb[3].mxu0  ;;  %v1091_v27 = vpop.f32.mrb[3].mxu1  ;;  %v1479_v28 = vmax.f32 %v1415_v18, 0.0  ;;  %v1511_v29 = vmax.f32 %v1447_v19, 0.0 }
 0x10f   : > { %v1480_v30 = vmax.f32 %v1416_v24, 0.0  ;;  %v1512_v31 = vmax.f32 %v1448_v25, 0.0 }
 0x111   : > { %v2245_v32 = vpack.c.bf16 %v1480_v30, %v1479_v28  ;;  %v2325_v33 = vpack.c.bf16 %v1512_v31, %v1511_v29 }
 0x112   : > { %v966_v34 = vpop.f32.mrb[4].mxu0  ;;  %v1094_v35 = vpop.f32.mrb[4].mxu1 }
 0x113   : > { %2246 = vst [vmem:[%s2922_s11] sm:$0xff] %v2245_v32   ;;  %2417 = vst [vmem:[%s2922_s11 + $0x80] sm:$0xff] %v2325_v33   ;;  %v1417_v36 = vadd.f32 %v2913_v15, %v966_v34  ;;  %v1449_v37 = vadd.f32 %v2913_v15, %v1094_v35  ;;  %v968_v38 = vpop.f32.mrb[5].mxu0  ;;  %v1096_v39 = vpop.f32.mrb[5].mxu1 }
 0x114   : > { %v969_v40 = vpop.f32.mrb[6].mxu0  ;;  %v1097_v41 = vpop.f32.mrb[6].mxu1 }
 0x115   : > { %v1418_v42 = vadd.f32 %v2913_v15, %v969_v40  ;;  %v1450_v43 = vadd.f32 %v2913_v15, %v1097_v41  ;;  %v971_v44 = vpop.f32.mrb[7].mxu0  ;;  %v1099_v45 = vpop.f32.mrb[7].mxu1  ;;  %v1481_v46 = vmax.f32 %v1417_v36, 0.0  ;;  %v1513_v47 = vmax.f32 %v1449_v37, 0.0 }
 0x117   : > { %v1482_v48 = vmax.f32 %v1418_v42, 0.0  ;;  %v1514_v49 = vmax.f32 %v1450_v43, 0.0 }
 0x119   : > { %v2250_v50 = vpack.c.bf16 %v1482_v48, %v1481_v46  ;;  %v2330_v51 = vpack.c.bf16 %v1514_v49, %v1513_v47 }
 0x11a   : > { %v974_v52 = vpop.f32.mrb[8].mxu0  ;;  %v1102_v53 = vpop.f32.mrb[8].mxu1 }
 0x11b   : > { %2402 = vst [vmem:[%s2922_s11 + $0x8] sm:$0xff] %v2250_v50   ;;  %2418 = vst [vmem:[%s2922_s11 + $0x88] sm:$0xff] %v2330_v51   ;;  %v1419_v54 = vadd.f32 %v2913_v15, %v974_v52  ;;  %v1451_v55 = vadd.f32 %v2913_v15, %v1102_v53  ;;  %v976_v56 = vpop.f32.mrb[9].mxu0  ;;  %v1104_v57 = vpop.f32.mrb[9].mxu1 }
 0x11c   : > { %v977_v58 = vpop.f32.mrb[10].mxu0  ;;  %v1105_v59 = vpop.f32.mrb[10].mxu1 }
 0x11d   : > { %v1420_v60 = vadd.f32 %v2913_v15, %v977_v58  ;;  %v1452_v61 = vadd.f32 %v2913_v15, %v1105_v59  ;;  %v979_v62 = vpop.f32.mrb[11].mxu0  ;;  %v1107_v63 = vpop.f32.mrb[11].mxu1  ;;  %v1483_v0 = vmax.f32 %v1419_v54, 0.0  ;;  %v1515_v1 = vmax.f32 %v1451_v55, 0.0 }
 0x11f   : > { %v1484_v2 = vmax.f32 %v1420_v60, 0.0  ;;  %v1516_v3 = vmax.f32 %v1452_v61, 0.0 }
 0x121   : > { %v2255_v4 = vpack.c.bf16 %v1484_v2, %v1483_v0  ;;  %v2335_v5 = vpack.c.bf16 %v1516_v3, %v1515_v1 }
 0x122   : > { %v982_v6 = vpop.f32.mrb[12].mxu0  ;;  %v1110_v7 = vpop.f32.mrb[12].mxu1 }
 0x123   : > { %2403 = vst [vmem:[%s2922_s11 + $0x10] sm:$0xff] %v2255_v4   ;;  %2419 = vst [vmem:[%s2922_s11 + $0x90] sm:$0xff] %v2335_v5   ;;  %v1421_v8 = vadd.f32 %v2913_v15, %v982_v6  ;;  %v1453_v9 = vadd.f32 %v2913_v15, %v1110_v7  ;;  %v984_v10 = vpop.f32.mrb[13].mxu0  ;;  %v1112_v11 = vpop.f32.mrb[13].mxu1 }
 0x124   : > { %v985_v12 = vpop.f32.mrb[14].mxu0  ;;  %v1113_v13 = vpop.f32.mrb[14].mxu1 }
 0x125   : > { %v1422_v14 = vadd.f32 %v2913_v15, %v985_v12  ;;  %v1454_v16 = vadd.f32 %v2913_v15, %v1113_v13  ;;  %v987_v17 = vpop.f32.mrb[15].mxu0  ;;  %v1115_v18 = vpop.f32.mrb[15].mxu1  ;;  %v1485_v19 = vmax.f32 %v1421_v8, 0.0  ;;  %v1517_v20 = vmax.f32 %v1453_v9, 0.0 }
 0x127   : > { %v1486_v21 = vmax.f32 %v1422_v14, 0.0  ;;  %v1518_v22 = vmax.f32 %v1454_v16, 0.0 }
 0x129   : > { %v2260_v23 = vpack.c.bf16 %v1486_v21, %v1485_v19  ;;  %v2340_v24 = vpack.c.bf16 %v1518_v22, %v1517_v20 }
 0x12a   : > { %v990_v25 = vpop.f32.mrb[16].mxu0  ;;  %v1118_v26 = vpop.f32.mrb[16].mxu1 }
 0x12b   : > { %2404 = vst [vmem:[%s2922_s11 + $0x18] sm:$0xff] %v2260_v23   ;;  %2420 = vst [vmem:[%s2922_s11 + $0x98] sm:$0xff] %v2340_v24   ;;  %v1423_v27 = vadd.f32 %v2913_v15, %v990_v25  ;;  %v1455_v28 = vadd.f32 %v2913_v15, %v1118_v26  ;;  %v992_v29 = vpop.f32.mrb[17].mxu0  ;;  %v1120_v30 = vpop.f32.mrb[17].mxu1 }
 0x12c   : > { %v993_v31 = vpop.f32.mrb[18].mxu0  ;;  %v1121_v32 = vpop.f32.mrb[18].mxu1 }
 0x12d   : > { %v1424_v33 = vadd.f32 %v2913_v15, %v993_v31  ;;  %v1456_v34 = vadd.f32 %v2913_v15, %v1121_v32  ;;  %v995_v35 = vpop.f32.mrb[19].mxu0  ;;  %v1123_v36 = vpop.f32.mrb[19].mxu1  ;;  %v1487_v37 = vmax.f32 %v1423_v27, 0.0  ;;  %v1519_v38 = vmax.f32 %v1455_v28, 0.0 }
 0x12f   : > { %v1488_v39 = vmax.f32 %v1424_v33, 0.0  ;;  %v1520_v40 = vmax.f32 %v1456_v34, 0.0 }
 0x131   : > { %v2265_v41 = vpack.c.bf16 %v1488_v39, %v1487_v37  ;;  %v2345_v42 = vpack.c.bf16 %v1520_v40, %v1519_v38 }
 0x132   : > { %v998_v43 = vpop.f32.mrb[20].mxu0  ;;  %v1126_v44 = vpop.f32.mrb[20].mxu1 }
 0x133   : > { %2405 = vst [vmem:[%s2922_s11 + $0x20] sm:$0xff] %v2265_v41   ;;  %2421 = vst [vmem:[%s2922_s11 + $0xa0] sm:$0xff] %v2345_v42   ;;  %v1425_v45 = vadd.f32 %v2913_v15, %v998_v43  ;;  %v1457_v46 = vadd.f32 %v2913_v15, %v1126_v44  ;;  %v1000_v47 = vpop.f32.mrb[21].mxu0  ;;  %v1128_v48 = vpop.f32.mrb[21].mxu1 }
 0x134   : > { %v1001_v49 = vpop.f32.mrb[22].mxu0  ;;  %v1129_v50 = vpop.f32.mrb[22].mxu1 }
 0x135   : > { %v1426_v51 = vadd.f32 %v2913_v15, %v1001_v49  ;;  %v1458_v52 = vadd.f32 %v2913_v15, %v1129_v50  ;;  %v1003_v53 = vpop.f32.mrb[23].mxu0  ;;  %v1131_v54 = vpop.f32.mrb[23].mxu1  ;;  %v1489_v55 = vmax.f32 %v1425_v45, 0.0  ;;  %v1521_v56 = vmax.f32 %v1457_v46, 0.0 }
 0x137   : > { %v1490_v57 = vmax.f32 %v1426_v51, 0.0  ;;  %v1522_v58 = vmax.f32 %v1458_v52, 0.0 }
 0x139   : > { %v2270_v59 = vpack.c.bf16 %v1490_v57, %v1489_v55  ;;  %v2350_v60 = vpack.c.bf16 %v1522_v58, %v1521_v56 }
 0x13a   : > { %v1006_v61 = vpop.f32.mrb[24].mxu0  ;;  %v1134_v62 = vpop.f32.mrb[24].mxu1 }
 0x13b   : > { %2406 = vst [vmem:[%s2922_s11 + $0x28] sm:$0xff] %v2270_v59   ;;  %2422 = vst [vmem:[%s2922_s11 + $0xa8] sm:$0xff] %v2350_v60   ;;  %v1427_v63 = vadd.f32 %v2913_v15, %v1006_v61  ;;  %v1459_v0 = vadd.f32 %v2913_v15, %v1134_v62  ;;  %v1008_v1 = vpop.f32.mrb[25].mxu0  ;;  %v1136_v2 = vpop.f32.mrb[25].mxu1 }
 0x13c   : > { %v1009_v3 = vpop.f32.mrb[26].mxu0  ;;  %v1137_v4 = vpop.f32.mrb[26].mxu1 }
 0x13d   : > { %v1428_v5 = vadd.f32 %v2913_v15, %v1009_v3  ;;  %v1460_v6 = vadd.f32 %v2913_v15, %v1137_v4  ;;  %v1011_v7 = vpop.f32.mrb[27].mxu0  ;;  %v1139_v8 = vpop.f32.mrb[27].mxu1  ;;  %v1491_v9 = vmax.f32 %v1427_v63, 0.0  ;;  %v1523_v10 = vmax.f32 %v1459_v0, 0.0 }
 0x13f   : > { %v1492_v11 = vmax.f32 %v1428_v5, 0.0  ;;  %v1524_v12 = vmax.f32 %v1460_v6, 0.0 }
 0x141   : > { %v2275_v13 = vpack.c.bf16 %v1492_v11, %v1491_v9  ;;  %v2355_v14 = vpack.c.bf16 %v1524_v12, %v1523_v10 }
 0x142   : > { %v1014_v16 = vpop.f32.mrb[28].mxu0  ;;  %v1142_v17 = vpop.f32.mrb[28].mxu1 }
 0x143   : > { %2407 = vst [vmem:[%s2922_s11 + $0x30] sm:$0xff] %v2275_v13   ;;  %2423 = vst [vmem:[%s2922_s11 + $0xb0] sm:$0xff] %v2355_v14   ;;  %v1429_v18 = vadd.f32 %v2913_v15, %v1014_v16  ;;  %v1461_v19 = vadd.f32 %v2913_v15, %v1142_v17  ;;  %v1016_v20 = vpop.f32.mrb[29].mxu0  ;;  %v1144_v21 = vpop.f32.mrb[29].mxu1 }
 0x144   : > { %v1017_v22 = vpop.f32.mrb[30].mxu0  ;;  %v1145_v23 = vpop.f32.mrb[30].mxu1 }
 0x145   : > { %v1430_v24 = vadd.f32 %v2913_v15, %v1017_v22  ;;  %v1462_v25 = vadd.f32 %v2913_v15, %v1145_v23  ;;  %v1019_v26 = vpop.f32.mrb[31].mxu0  ;;  %v1147_v27 = vpop.f32.mrb[31].mxu1  ;;  %v1493_v28 = vmax.f32 %v1429_v18, 0.0  ;;  %v1525_v29 = vmax.f32 %v1461_v19, 0.0 }
 0x147   : > { %v1494_v30 = vmax.f32 %v1430_v24, 0.0  ;;  %v1526_v31 = vmax.f32 %v1462_v25, 0.0 }
 0x149   : > { %v2280_v32 = vpack.c.bf16 %v1494_v30, %v1493_v28  ;;  %v2360_v33 = vpack.c.bf16 %v1526_v31, %v1525_v29 }
 0x14a   : > { %v1022_v34 = vpop.f32.mrb[32].mxu0  ;;  %v1150_v35 = vpop.f32.mrb[32].mxu1 }
 0x14b   : > { %2408 = vst [vmem:[%s2922_s11 + $0x38] sm:$0xff] %v2280_v32   ;;  %2424 = vst [vmem:[%s2922_s11 + $0xb8] sm:$0xff] %v2360_v33   ;;  %v1431_v36 = vadd.f32 %v2913_v15, %v1022_v34  ;;  %v1463_v37 = vadd.f32 %v2913_v15, %v1150_v35  ;;  %v1024_v38 = vpop.f32.mrb[33].mxu0  ;;  %v1152_v39 = vpop.f32.mrb[33].mxu1 }
 0x14c   : > { %v1025_v40 = vpop.f32.mrb[34].mxu0  ;;  %v1153_v41 = vpop.f32.mrb[34].mxu1 }
 0x14d   : > { %v1432_v42 = vadd.f32 %v2913_v15, %v1025_v40  ;;  %v1464_v43 = vadd.f32 %v2913_v15, %v1153_v41  ;;  %v1027_v44 = vpop.f32.mrb[35].mxu0  ;;  %v1155_v45 = vpop.f32.mrb[35].mxu1  ;;  %v1495_v46 = vmax.f32 %v1431_v36, 0.0  ;;  %v1527_v47 = vmax.f32 %v1463_v37, 0.0 }
 0x14f   : > { %v1496_v48 = vmax.f32 %v1432_v42, 0.0  ;;  %v1528_v49 = vmax.f32 %v1464_v43, 0.0 }
 0x151   : > { %v2285_v50 = vpack.c.bf16 %v1496_v48, %v1495_v46  ;;  %v2365_v51 = vpack.c.bf16 %v1528_v49, %v1527_v47 }
 0x152   : > { %v1030_v52 = vpop.f32.mrb[36].mxu0  ;;  %v1158_v53 = vpop.f32.mrb[36].mxu1 }
 0x153   : > { %2409 = vst [vmem:[%s2922_s11 + $0x40] sm:$0xff] %v2285_v50   ;;  %2425 = vst [vmem:[%s2922_s11 + $0xc0] sm:$0xff] %v2365_v51   ;;  %v1433_v54 = vadd.f32 %v2913_v15, %v1030_v52  ;;  %v1465_v55 = vadd.f32 %v2913_v15, %v1158_v53  ;;  %v1032_v56 = vpop.f32.mrb[37].mxu0  ;;  %v1160_v57 = vpop.f32.mrb[37].mxu1 }
 0x154   : > { %v1033_v58 = vpop.f32.mrb[38].mxu0  ;;  %v1161_v59 = vpop.f32.mrb[38].mxu1 }
 0x155   : > { %v1434_v60 = vadd.f32 %v2913_v15, %v1033_v58  ;;  %v1466_v61 = vadd.f32 %v2913_v15, %v1161_v59  ;;  %v1035_v62 = vpop.f32.mrb[39].mxu0  ;;  %v1163_v63 = vpop.f32.mrb[39].mxu1  ;;  %v1497_v0 = vmax.f32 %v1433_v54, 0.0  ;;  %v1529_v1 = vmax.f32 %v1465_v55, 0.0 }
 0x157   : > { %v1498_v2 = vmax.f32 %v1434_v60, 0.0  ;;  %v1530_v3 = vmax.f32 %v1466_v61, 0.0 }
 0x159   : > { %v2290_v4 = vpack.c.bf16 %v1498_v2, %v1497_v0  ;;  %v2370_v5 = vpack.c.bf16 %v1530_v3, %v1529_v1 }
 0x15a   : > { %v1038_v6 = vpop.f32.mrb[40].mxu0  ;;  %v1166_v7 = vpop.f32.mrb[40].mxu1 }
 0x15b   : > { %2410 = vst [vmem:[%s2922_s11 + $0x48] sm:$0xff] %v2290_v4   ;;  %2426 = vst [vmem:[%s2922_s11 + $0xc8] sm:$0xff] %v2370_v5   ;;  %v1435_v8 = vadd.f32 %v2913_v15, %v1038_v6  ;;  %v1467_v9 = vadd.f32 %v2913_v15, %v1166_v7  ;;  %v1040_v10 = vpop.f32.mrb[41].mxu0  ;;  %v1168_v11 = vpop.f32.mrb[41].mxu1 }
 0x15c   : > { %v1041_v12 = vpop.f32.mrb[42].mxu0  ;;  %v1169_v13 = vpop.f32.mrb[42].mxu1 }
 0x15d   : > { %v1436_v14 = vadd.f32 %v2913_v15, %v1041_v12  ;;  %v1468_v16 = vadd.f32 %v2913_v15, %v1169_v13  ;;  %v1043_v17 = vpop.f32.mrb[43].mxu0  ;;  %v1171_v18 = vpop.f32.mrb[43].mxu1  ;;  %v1499_v19 = vmax.f32 %v1435_v8, 0.0  ;;  %v1531_v20 = vmax.f32 %v1467_v9, 0.0 }
 0x15f   : > { %v1500_v21 = vmax.f32 %v1436_v14, 0.0  ;;  %v1532_v22 = vmax.f32 %v1468_v16, 0.0 }
 0x161   : > { %v2295_v23 = vpack.c.bf16 %v1500_v21, %v1499_v19  ;;  %v2375_v24 = vpack.c.bf16 %v1532_v22, %v1531_v20 }
 0x162   : > { %v1046_v25 = vpop.f32.mrb[44].mxu0  ;;  %v1174_v26 = vpop.f32.mrb[44].mxu1 }
 0x163   : > { %2411 = vst [vmem:[%s2922_s11 + $0x50] sm:$0xff] %v2295_v23   ;;  %2427 = vst [vmem:[%s2922_s11 + $0xd0] sm:$0xff] %v2375_v24   ;;  %v1437_v27 = vadd.f32 %v2913_v15, %v1046_v25  ;;  %v1469_v28 = vadd.f32 %v2913_v15, %v1174_v26  ;;  %v1048_v29 = vpop.f32.mrb[45].mxu0  ;;  %v1176_v30 = vpop.f32.mrb[45].mxu1 }
 0x164   : > { %v1049_v31 = vpop.f32.mrb[46].mxu0  ;;  %v1177_v32 = vpop.f32.mrb[46].mxu1 }
 0x165   : > { %v1438_v33 = vadd.f32 %v2913_v15, %v1049_v31  ;;  %v1470_v34 = vadd.f32 %v2913_v15, %v1177_v32  ;;  %v1051_v35 = vpop.f32.mrb[47].mxu0  ;;  %v1179_v36 = vpop.f32.mrb[47].mxu1  ;;  %v1501_v37 = vmax.f32 %v1437_v27, 0.0  ;;  %v1533_v38 = vmax.f32 %v1469_v28, 0.0 }
 0x167   : > { %v1502_v39 = vmax.f32 %v1438_v33, 0.0  ;;  %v1534_v40 = vmax.f32 %v1470_v34, 0.0 }
 0x169   : > { %v2300_v41 = vpack.c.bf16 %v1502_v39, %v1501_v37  ;;  %v2380_v42 = vpack.c.bf16 %v1534_v40, %v1533_v38 }
 0x16a   : > { %v1054_v43 = vpop.f32.mrb[48].mxu0  ;;  %v1182_v44 = vpop.f32.mrb[48].mxu1 }
 0x16b   : > { %2412 = vst [vmem:[%s2922_s11 + $0x58] sm:$0xff] %v2300_v41   ;;  %2428 = vst [vmem:[%s2922_s11 + $0xd8] sm:$0xff] %v2380_v42   ;;  %v1439_v45 = vadd.f32 %v2913_v15, %v1054_v43  ;;  %v1471_v46 = vadd.f32 %v2913_v15, %v1182_v44  ;;  %v1056_v47 = vpop.f32.mrb[49].mxu0  ;;  %v1184_v48 = vpop.f32.mrb[49].mxu1 }
 0x16c   : > { %v1057_v49 = vpop.f32.mrb[50].mxu0  ;;  %v1185_v50 = vpop.f32.mrb[50].mxu1 }
 0x16d   : > { %v1440_v51 = vadd.f32 %v2913_v15, %v1057_v49  ;;  %v1472_v52 = vadd.f32 %v2913_v15, %v1185_v50  ;;  %v1059_v53 = vpop.f32.mrb[51].mxu0  ;;  %v1187_v54 = vpop.f32.mrb[51].mxu1  ;;  %v1503_v55 = vmax.f32 %v1439_v45, 0.0  ;;  %v1535_v56 = vmax.f32 %v1471_v46, 0.0 }
 0x16f   : > { %v1504_v57 = vmax.f32 %v1440_v51, 0.0  ;;  %v1536_v58 = vmax.f32 %v1472_v52, 0.0 }
 0x171   : > { %v2305_v59 = vpack.c.bf16 %v1504_v57, %v1503_v55  ;;  %v2385_v60 = vpack.c.bf16 %v1536_v58, %v1535_v56 }
 0x172   : > { %v1062_v61 = vpop.f32.mrb[52].mxu0  ;;  %v1190_v62 = vpop.f32.mrb[52].mxu1 }
 0x173   : > { %2413 = vst [vmem:[%s2922_s11 + $0x60] sm:$0xff] %v2305_v59   ;;  %2429 = vst [vmem:[%s2922_s11 + $0xe0] sm:$0xff] %v2385_v60   ;;  %v1441_v63 = vadd.f32 %v2913_v15, %v1062_v61  ;;  %v1473_v0 = vadd.f32 %v2913_v15, %v1190_v62  ;;  %v1064_v1 = vpop.f32.mrb[53].mxu0  ;;  %v1192_v2 = vpop.f32.mrb[53].mxu1 }
 0x174   : > { %v1065_v3 = vpop.f32.mrb[54].mxu0  ;;  %v1193_v4 = vpop.f32.mrb[54].mxu1 }
 0x175   : > { %v1442_v5 = vadd.f32 %v2913_v15, %v1065_v3  ;;  %v1474_v6 = vadd.f32 %v2913_v15, %v1193_v4  ;;  %v1067_v7 = vpop.f32.mrb[55].mxu0  ;;  %v1195_v8 = vpop.f32.mrb[55].mxu1  ;;  %v1505_v9 = vmax.f32 %v1441_v63, 0.0  ;;  %v1537_v10 = vmax.f32 %v1473_v0, 0.0 }
 0x177   : > { %v1506_v11 = vmax.f32 %v1442_v5, 0.0  ;;  %v1538_v12 = vmax.f32 %v1474_v6, 0.0 }
 0x179   : > { %v2310_v13 = vpack.c.bf16 %v1506_v11, %v1505_v9  ;;  %v2390_v14 = vpack.c.bf16 %v1538_v12, %v1537_v10 }
 0x17a   : > { %v1070_v16 = vpop.f32.mrb[56].mxu0  ;;  %v1198_v17 = vpop.f32.mrb[56].mxu1 }
 0x17b   : > { %2414 = vst [vmem:[%s2922_s11 + $0x68] sm:$0xff] %v2310_v13   ;;  %2430 = vst [vmem:[%s2922_s11 + $0xe8] sm:$0xff] %v2390_v14   ;;  %v1443_v18 = vadd.f32 %v2913_v15, %v1070_v16  ;;  %v1475_v19 = vadd.f32 %v2913_v15, %v1198_v17  ;;  %v1072_v20 = vpop.f32.mrb[57].mxu0  ;;  %v1200_v21 = vpop.f32.mrb[57].mxu1 }
 0x17c   : > { %v1073_v22 = vpop.f32.mrb[58].mxu0  ;;  %v1201_v23 = vpop.f32.mrb[58].mxu1 }
 0x17d   : > { %v1444_v24 = vadd.f32 %v2913_v15, %v1073_v22  ;;  %v1476_v25 = vadd.f32 %v2913_v15, %v1201_v23  ;;  %v1075_v26 = vpop.f32.mrb[59].mxu0  ;;  %v1203_v27 = vpop.f32.mrb[59].mxu1  ;;  %v1507_v28 = vmax.f32 %v1443_v18, 0.0  ;;  %v1539_v29 = vmax.f32 %v1475_v19, 0.0 }
 0x17f   : > { %v1508_v30 = vmax.f32 %v1444_v24, 0.0  ;;  %v1540_v31 = vmax.f32 %v1476_v25, 0.0 }
 0x181   : > { %v2315_v32 = vpack.c.bf16 %v1508_v30, %v1507_v28  ;;  %v2395_v33 = vpack.c.bf16 %v1540_v31, %v1539_v29 }
 0x182   : > { %v1078_v34 = vpop.f32.mrb[60].mxu0  ;;  %v1206_v35 = vpop.f32.mrb[60].mxu1 }
 0x183   : > { %2415 = vst [vmem:[%s2922_s11 + $0x70] sm:$0xff] %v2315_v32   ;;  %2431 = vst [vmem:[%s2922_s11 + $0xf0] sm:$0xff] %v2395_v33   ;;  %v1445_v36 = vadd.f32 %v2913_v15, %v1078_v34  ;;  %v1477_v37 = vadd.f32 %v2913_v15, %v1206_v35  ;;  %v1080_v38 = vpop.f32.mrb[61].mxu0  ;;  %v1208_v39 = vpop.f32.mrb[61].mxu1 }
 0x184   : > { %v1081_v40 = vpop.f32.mrb[62].mxu0  ;;  %v1209_v41 = vpop.f32.mrb[62].mxu1 }
 0x185   : > { %v1446_v42 = vadd.f32 %v2913_v15, %v1081_v40  ;;  %v1478_v43 = vadd.f32 %v2913_v15, %v1209_v41  ;;  %v1083_v44 = vpop.f32.mrb[63].mxu0  ;;  %v1211_v45 = vpop.f32.mrb[63].mxu1  ;;  %v1509_v46 = vmax.f32 %v1445_v36, 0.0  ;;  %v1541_v47 = vmax.f32 %v1477_v37, 0.0 }
 0x187   : > { %v1510_v48 = vmax.f32 %v1446_v42, 0.0  ;;  %v1542_v49 = vmax.f32 %v1478_v43, 0.0 }
 0x189   : > { %v2320_v15 = vpack.c.bf16 %v1510_v48, %v1509_v46  ;;  %v2400_v50 = vpack.c.bf16 %v1542_v49, %v1541_v47 }
 0x18b   : > { %2416 = vst [vmem:[%s2922_s11 + $0x78] sm:$0xff] %v2320_v15   ;;  %2432 = vst [vmem:[%s2922_s11 + $0xf8] sm:$0xff] %v2400_v50  }
 0x18c   : > { %2631 = shalt.err (!%p2628_p5)
}
 0x18d   : > { %s2632_s4 = scalar_lea.hbm %s3019_s26, 4096  ;;  %s2636_s7 = scalar_lea.hbm %s3076_s3, 16384 }
 0x18e   : > { %p2633_p6 = scmp.ne.s32.totalorder %s3019_s26, %s2632_s4  ;;  %p2637_p10 = scmp.lt.u32.totalorder %s3019_s26, %s3076_s3 }
 0x18f   : > { %p2638_p11 = scmp.lt.u32.totalorder %s2636_s7, %s2632_s4  ;;  %p2640_p13 = scmp.lt.u32.totalorder %s2632_s4, %s3019_s26 }
 0x190   : > { %p2634_p7 = pnand %p2633_p6, %p2763_p4 }
 0x191   : > { %p2639_p12 = por %p2638_p11, %p2637_p10 }
 0x192   : > { %p2635_p9 = pneg %p2634_p7 }
 0x193   : > { %p2641_p0 = por %p2640_p13, %p2639_p12 }
 0x195   : > { %p2642_p1 = pnand %p2641_p0, %p2635_p9 }
 0x197   : > { %2645 = shalt.err (!%p2642_p1)
}
 0x198   : > { %s2701_s10 = smov 64   ;;  %s2702_s11 = smov 4  }
 0x199   : > { %2453 = dma.vmem_to_hbm [thread:$0]  (%p2763_p4), %s3021_s19, 4096, %s3019_s26, %s3027_s15, %s2701_s10, %s2701_s10, %s2702_s11  }
 0x19a PF: > { %p2459_p2 = scmp.ge.s32.totalorder %s2696_s17, 2  ;;  %s1893_s18 = sand.u32 1, %s2676_s12  }
 0x19b   : > { %s1894_s21 = scalar_lea.sflag [#allocation4], %s1893_s18 }
 0x19c   : > { %p2456_p3 = pnand %p2459_p2, %p2770_p8 }
 0x19e   : > { %2671 = dma.done.wait (!%p2456_p3), %s1894_s21, 4096  }
 0x19f   : > { %2673 = vsyncadd (!%p2456_p3), %s1894_s21, 4294963200  ;;  %s16_s17 = sadd.s32 1, %s2696_s17   ;;  %s3079_s12 = smov %s2680_s13 }
 0x1a0   : > { %p13_p5 = scmp.ge.s32.totalorder %s16_s17, 6   ;;  %s3080_s13 = smov %s2684_s14 }
 0x1a1   : > { %s3081_s14 = smov %s2776_s25  ;;  %s3082_s15 = smov %s2692_s16 }
 0x1a2   : > { %s3083_s16 = smov %s3085_s20  ;;  %15 = sbr.rel (!%p13_p5) target bundleno = 4 (0x4), region = 81 }
 0x1a9   :  { %1899 = vsyncpa [#allocation4], 1 }
 0x1aa   :  { %1901 = vsyncpa [#allocation4 + $0x1], 1 }

</bundles_post_ra>
